<compile_context>
chip_gen: v7x
topology: tpu7x:2x2x1
jax: 0.10.0
libtpu: 0.0.40
codegen_flags: <defaults>
</compile_context>

<pallas_src>
import jax
import jax.numpy as jnp
from jax.experimental import pallas as pl
from jax.experimental.pallas import tpu as pltpu

IN_F = 3
HID_F = 2
OUT_F = 1
N_PARAMS = HID_F * IN_F + HID_F + OUT_F * HID_F + OUT_F  # 11 scalars total

LANES = 512     # lane-axis width of the batch layout (multiple of 128)
TR_MAX = 512    # max sublane rows per grid step -> 3 MiB input tile (f32)


def mlp_kernel(params_ref, x_ref, o_ref):
    """params_ref: SMEM f32[11] = [w1(2x3 row-major), b1(2), w2(1x2), b2(1)]
    x_ref:      VMEM f32[IN_F, tr, LANES]   (batch dense over sublanes x lanes)
    o_ref:      VMEM f32[tr, LANES]
    """
    x0 = x_ref[0]          # [tr, LANES] dense tiles
    x1 = x_ref[1]
    x2 = x_ref[2]

    # Layer 1: Linear(3, 2) as scalar-broadcast FMAs on the VPU (no MXU).
    h0 = (params_ref[0] * x0 + params_ref[1] * x1 + params_ref[2] * x2
          + params_ref[6])
    h1 = (params_ref[3] * x0 + params_ref[4] * x1 + params_ref[5] * x2
          + params_ref[7])

    # ReLU
    a0 = jnp.maximum(h0, 0.0)
    a1 = jnp.maximum(h1, 0.0)

    # Layer 2: Linear(2, 1)  -> full-width unmasked store
    o_ref[...] = (params_ref[8] * a0 + params_ref[9] * a1
                  + params_ref[10]).astype(o_ref.dtype)


def mlp_reference(x, w1, b1, w2, b2):
    h = jnp.maximum(x @ w1.T + b1, 0.0)
    return h @ w2.T + b2


@jax.jit
def mlp_forward(x, w1, b1, w2, b2):
    """x: [B, IN_F] (or [IN_F]); w1: [HID_F, IN_F]; b1: [HID_F];
    w2: [OUT_F, HID_F]; b2: [OUT_F].  Returns [B, OUT_F] (or [OUT_F])."""
    squeeze = x.ndim == 1
    if squeeze:
        x = x.reshape(1, IN_F)
    B = x.shape[0]

    # Tiny batches: fused XLA is strictly faster than any pallas_call launch.
    if B < LANES:  # B is static under jit
        out = mlp_reference(x.astype(jnp.float32), w1, b1, w2, b2)
        return out.reshape(OUT_F) if squeeze else out

    # ---- layout plumbing: feature-major, batch dense over (sublane, lane) ----
    # transpose + (small) lane pad + reshape fuse into a single XLA copy.
    b_pad = pl.cdiv(B, LANES) * LANES
    n_rows = b_pad // LANES
    x_f = x.T.astype(jnp.float32)                       # [IN_F, B]
    if b_pad != B:
        x_f = jnp.pad(x_f, ((0, 0), (0, b_pad - B)))    # pad < LANES elems/row
    x_f = x_f.reshape(IN_F, n_rows, LANES)              # [IN_F, n_rows, LANES]

    # ---- row-tile selection (all static) ----
    if n_rows > TR_MAX:
        tr = TR_MAX                                     # big MB-scale tiles
    elif n_rows >= 16:
        # >= 2 grid blocks so v7x megacore can shard batch tiles across TCs.
        tr = (((n_rows + 1) // 2) + 7) // 8 * 8         # multiple of 8
    else:
        tr = n_rows                                     # block == full dim
    n_blocks = pl.cdiv(n_rows, tr)                      # ragged tail is clipped
                                                        # by Pallas boundary
                                                        # block handling

    # All parameters in one flat SMEM-resident operand (stays put across grid).
    params = jnp.concatenate(
        [w1.reshape(-1), b1.reshape(-1), w2.reshape(-1), b2.reshape(-1)]
    ).astype(jnp.float32)                               # [N_PARAMS]

    out_2d = pl.pallas_call(
        mlp_kernel,
        out_shape=jax.ShapeDtypeStruct((n_rows, LANES), jnp.float32),
        grid=(n_blocks,),
        in_specs=[
            # whole parameter vector, resident in SMEM across the grid
            pl.BlockSpec(memory_space=pltpu.MemorySpace.SMEM),
            # dense (sublane x lane) batch tile of the feature-major input
            pl.BlockSpec((IN_F, tr, LANES), lambda i: (0, i, 0)),
        ],
        out_specs=pl.BlockSpec((tr, LANES), lambda i: (i, 0)),
        compiler_params=pltpu.CompilerParams(
            dimension_semantics=("parallel",)),         # shard batch tiles
    )(params, x_f)

    out = out_2d.reshape(b_pad)[:B].reshape(B, OUT_F)
    if squeeze:
        out = out.reshape(OUT_F)
    return out


if __name__ == "__main__":
    key = jax.random.PRNGKey(0)
    k1, k2, k3, k4, kx1, kx2 = jax.random.split(key, 6)

    # PyTorch nn.Linear-style uniform(-1/sqrt(fan_in), 1/sqrt(fan_in)) init.
    bound1 = 1.0 / jnp.sqrt(jnp.float32(IN_F))
    bound2 = 1.0 / jnp.sqrt(jnp.float32(HID_F))
    w1 = jax.random.uniform(k1, (HID_F, IN_F), jnp.float32, -bound1, bound1)
    b1 = jax.random.uniform(k2, (HID_F,), jnp.float32, -bound1, bound1)
    w2 = jax.random.uniform(k3, (OUT_F, HID_F), jnp.float32, -bound2, bound2)
    b2 = jax.random.uniform(k4, (OUT_F,), jnp.float32, -bound2, bound2)

    # Kernel path #1: single grid block, lane-pad exercised (1000 -> 1024).
    B1 = 1000
    x1 = jax.random.normal(kx1, (B1, IN_F), jnp.float32)
    out1 = jax.block_until_ready(mlp_forward(x1, w1, b1, w2, b2))
    ref1 = mlp_reference(x1, w1, b1, w2, b2)
    assert out1.shape == (B1, OUT_F)
    assert jnp.allclose(out1, ref1, atol=1e-5, rtol=1e-5), (out1[:4], ref1[:4])

    # Kernel path #2: multi-block grid with ragged boundary-block clipping.
    B2 = 9000   # n_rows=18, tr=16 -> 2 "parallel" blocks, last one partial
    x2 = jax.random.normal(kx2, (B2, IN_F), jnp.float32)
    out2 = jax.block_until_ready(mlp_forward(x2, w1, b1, w2, b2))
    ref2 = mlp_reference(x2, w1, b1, w2, b2)
    assert out2.shape == (B2, OUT_F)
    assert jnp.allclose(out2, ref2, atol=1e-5, rtol=1e-5), (out2[:4], ref2[:4])

    # Original module usage: a single 3-vector input (torch.ones(3)).
    # Tiny batch -> dispatched to fused XLA at trace time (by design).
    x_vec = jnp.ones((IN_F,), jnp.float32)
    out_vec = jax.block_until_ready(mlp_forward(x_vec, w1, b1, w2, b2))
    ref_vec = mlp_reference(x_vec.reshape(1, IN_F), w1, b1, w2, b2).reshape(OUT_F)
    assert out_vec.shape == (OUT_F,)
    assert jnp.allclose(out_vec, ref_vec, atol=1e-5, rtol=1e-5), (out_vec, ref_vec)

    print("KERNEL_OK")
</pallas_src>

<mosaic_0001>
module attributes {stable_mosaic.version = 11 : i64} {
  func.func @mlp_kernel(%arg0: i32, %arg1: memref<11xf32, #tpu.memory_space<smem>>, %arg2: memref<3x2x512xf32, #tpu.memory_space<vmem>>, %arg3: memref<2x512xf32, #tpu.memory_space<vmem>>) attributes {dimension_semantics = [#tpu.dimension_semantics<parallel>], iteration_bounds = array<i64: 1>, scalar_prefetch = 0 : i64, scratch_operands = 0 : i64, tpu.core_type = #tpu.core_type<tc>, window_params = [{transform_indices = @transform_0, window_bounds = array<i64: 11>}, {transform_indices = @transform_1, window_bounds = array<i64: 3, 2, 512>}, {transform_indices = @transform_2, window_bounds = array<i64: 2, 512>}]} {
    %c0 = arith.constant 0 : index
    %c0_0 = arith.constant 0 : index
    %c0_1 = arith.constant 0 : index
    %0 = vector.load %arg2[%c0, %c0_0, %c0_1] : memref<3x2x512xf32, #tpu.memory_space<vmem>>, vector<1x2x512xf32>
    %1 = vector.shape_cast %0 : vector<1x2x512xf32> to vector<2x512xf32>
    %c1 = arith.constant 1 : index
    %c0_2 = arith.constant 0 : index
    %c0_3 = arith.constant 0 : index
    %2 = vector.load %arg2[%c1, %c0_2, %c0_3] : memref<3x2x512xf32, #tpu.memory_space<vmem>>, vector<1x2x512xf32>
    %3 = vector.shape_cast %2 : vector<1x2x512xf32> to vector<2x512xf32>
    %c2 = arith.constant 2 : index
    %c0_4 = arith.constant 0 : index
    %c0_5 = arith.constant 0 : index
    %4 = vector.load %arg2[%c2, %c0_4, %c0_5] : memref<3x2x512xf32, #tpu.memory_space<vmem>>, vector<1x2x512xf32>
    %5 = vector.shape_cast %4 : vector<1x2x512xf32> to vector<2x512xf32>
    %c0_6 = arith.constant 0 : index
    %6 = memref.load %arg1[%c0_6] : memref<11xf32, #tpu.memory_space<smem>>
    %7 = vector.broadcast %6 : f32 to vector<2x512xf32>
    %8 = arith.mulf %7, %1 : vector<2x512xf32>
    %c1_7 = arith.constant 1 : index
    %9 = memref.load %arg1[%c1_7] : memref<11xf32, #tpu.memory_space<smem>>
    %10 = vector.broadcast %9 : f32 to vector<2x512xf32>
    %11 = arith.mulf %10, %3 : vector<2x512xf32>
    %12 = arith.addf %8, %11 : vector<2x512xf32>
    %c2_8 = arith.constant 2 : index
    %13 = memref.load %arg1[%c2_8] : memref<11xf32, #tpu.memory_space<smem>>
    %14 = vector.broadcast %13 : f32 to vector<2x512xf32>
    %15 = arith.mulf %14, %5 : vector<2x512xf32>
    %16 = arith.addf %12, %15 : vector<2x512xf32>
    %c6 = arith.constant 6 : index
    %17 = memref.load %arg1[%c6] : memref<11xf32, #tpu.memory_space<smem>>
    %18 = vector.broadcast %17 : f32 to vector<2x512xf32>
    %19 = arith.addf %16, %18 : vector<2x512xf32>
    %c3 = arith.constant 3 : index
    %20 = memref.load %arg1[%c3] : memref<11xf32, #tpu.memory_space<smem>>
    %21 = vector.broadcast %20 : f32 to vector<2x512xf32>
    %22 = arith.mulf %21, %1 : vector<2x512xf32>
    %c4 = arith.constant 4 : index
    %23 = memref.load %arg1[%c4] : memref<11xf32, #tpu.memory_space<smem>>
    %24 = vector.broadcast %23 : f32 to vector<2x512xf32>
    %25 = arith.mulf %24, %3 : vector<2x512xf32>
    %26 = arith.addf %22, %25 : vector<2x512xf32>
    %c5 = arith.constant 5 : index
    %27 = memref.load %arg1[%c5] : memref<11xf32, #tpu.memory_space<smem>>
    %28 = vector.broadcast %27 : f32 to vector<2x512xf32>
    %29 = arith.mulf %28, %5 : vector<2x512xf32>
    %30 = arith.addf %26, %29 : vector<2x512xf32>
    %c7 = arith.constant 7 : index
    %31 = memref.load %arg1[%c7] : memref<11xf32, #tpu.memory_space<smem>>
    %32 = vector.broadcast %31 : f32 to vector<2x512xf32>
    %33 = arith.addf %30, %32 : vector<2x512xf32>
    %cst = arith.constant 0.000000e+00 : f32
    %34 = vector.broadcast %cst : f32 to vector<2x512xf32>
    %35 = arith.maximumf %19, %34 : vector<2x512xf32>
    %cst_9 = arith.constant 0.000000e+00 : f32
    %36 = vector.broadcast %cst_9 : f32 to vector<2x512xf32>
    %37 = arith.maximumf %33, %36 : vector<2x512xf32>
    %c8 = arith.constant 8 : index
    %38 = memref.load %arg1[%c8] : memref<11xf32, #tpu.memory_space<smem>>
    %39 = vector.broadcast %38 : f32 to vector<2x512xf32>
    %40 = arith.mulf %39, %35 : vector<2x512xf32>
    %c9 = arith.constant 9 : index
    %41 = memref.load %arg1[%c9] : memref<11xf32, #tpu.memory_space<smem>>
    %42 = vector.broadcast %41 : f32 to vector<2x512xf32>
    %43 = arith.mulf %42, %37 : vector<2x512xf32>
    %44 = arith.addf %40, %43 : vector<2x512xf32>
    %c10 = arith.constant 10 : index
    %45 = memref.load %arg1[%c10] : memref<11xf32, #tpu.memory_space<smem>>
    %46 = vector.broadcast %45 : f32 to vector<2x512xf32>
    %47 = arith.addf %44, %46 : vector<2x512xf32>
    %c0_10 = arith.constant 0 : index
    %c0_11 = arith.constant 0 : index
    %48 = vector.load %arg3[%c0_10, %c0_11] : memref<2x512xf32, #tpu.memory_space<vmem>>, vector<2x512xf32>
    tpu.vector_store %arg3[%c0_10, %c0_11], %47 {strides = array<i32>} : memref<2x512xf32, #tpu.memory_space<vmem>>, vector<2x512xf32>,
    return
  }
  func.func @transform_0(%arg0: i32) -> i32 {
    %c0_i32 = arith.constant 0 : i32
    %c0_i32_0 = arith.constant 0 : i32
    return %c0_i32 : i32
  }
  func.func @transform_1(%arg0: i32) -> (i32, i32, i32) {
    %c0_i32 = arith.constant 0 : i32
    %c0_i32_0 = arith.constant 0 : i32
    %c0_i32_1 = arith.constant 0 : i32
    return %c0_i32, %arg0, %c0_i32_0 : i32, i32, i32
  }
  func.func @transform_2(%arg0: i32) -> (i32, i32) {
    %c0_i32 = arith.constant 0 : i32
    %c0_i32_0 = arith.constant 0 : i32
    return %arg0, %c0_i32 : i32, i32
  }
}

</mosaic_0001>

<bundles_post_ra>
// kernel: mlp_forward.1
= control target key start
LH: loop header
LB: loop body
LE: loop exit
PB: predicated region body
PF: predicated region fallthrough
CT: control target
= control target key end

     0   :  { %7 = vsyncpa [#allocation3], 0  ;;  %s133_s0 = inlined_call_operand.vmem [shape: f32[11], index: 0, kind: input, shape index: {}]   ;;  %s134_s1 = inlined_call_operand.vmem [shape: f32[3,2,512], index: 1, kind: input, shape index: {}]   ;;  %s135_s2 = inlined_call_operand.vmem [shape: f32[2,512], index: 2, kind: output, shape index: {}]  }
   0x1   :  { %s14_s11 = sshll.u32 %s133_s0, 4  ;;  %s15_s11 = int_to_ptr.vmem [resolvable:$true] %s14_s11 }
   0x2   :  { %s88_s12 = scalar_lea.vmem %s15_s11, 16  ;;  %p93_p1 = scmp.lt.s32.totalorder %s15_s11, %s15_s11 }
   0x3   :  { %p89_p0 = scmp.ne.s32.totalorder %s15_s11, %s88_s12  ;;  %p94_p2 = scmp.lt.s32.totalorder %s88_s12, %s88_s12 }
   0x5   :  { %p95_p3 = por %p94_p2, %p93_p1 }
   0x7   :  { %p96_p4 = pnand %p95_p3, %p89_p0 }
   0x9   :  { %99 = shalt.err (!%p96_p4)
}
   0xa   :  { %s102_s13 = smov [#allocation2]  }
   0xb   :  { %17 = dma.vmem_to_smem %s15_s11, 16, %s102_s13, [#allocation3]  }
   0xc   :  { %100 = dma.done.wait [#allocation3], 16  }
   0xd   :  { %101 = vsyncadd [#allocation3], 4294967280 }
   0xe   :  { %23 = sfence }
   0xf   :  { %s29_s14 = sld [smem:[#allocation2]]  ;;  %s77_s15 = sld [smem:[#allocation2 + $0x1]]  ;;  %v24_v0 = vld [vmem:[%s134_s1] sm:$0xff]  ;;  %v75_v1 = vld [vmem:[%s134_s1 + $0x8] sm:$0xff]  ;;  %v76_v2 = vld [vmem:[%s134_s1 + $0x10] sm:$0xff] }
  0x10   :  { %s78_s16 = sld [smem:[#allocation2 + $0x2]]  ;;  %s79_s17 = sld [smem:[#allocation2 + $0x6]] }
  0x11   :  { %s80_s18 = sld [smem:[#allocation2 + $0x3]]  ;;  %s81_s19 = sld [smem:[#allocation2 + $0x4]] }
  0x12   :  { %s82_s0 = sld [smem:[#allocation2 + $0x5]]  ;;  %s83_s26 = sld [smem:[#allocation2 + $0x7]] }
  0x13   :  { %s84_s27 = sld [smem:[#allocation2 + $0x8]]  ;;  %s85_s28 = sld [smem:[#allocation2 + $0x9]] }
  0x14   :  { %s86_s1 = sld [smem:[#allocation2 + $0xa]] }
  0x15   :  { %v30_v3 = vstv %s29_s14  ;;  %v33_v5 = vstv %s77_s15 }
  0x16   :  { %v31_v4 = vmul.f32 %v30_v3, %v24_v0  ;;  %v37_v6 = vstv %s78_s16  ;;  %v34_v7 = vmul.f32 %v75_v1, %v33_v5  ;;  %v41_v16 = vstv %s79_s17 }
  0x17   :  { %v38_v8 = vmul.f32 %v76_v2, %v37_v6  ;;  %v44_v9 = vstv %s80_s18  ;;  %v47_v11 = vstv %s81_s19 }
  0x18   :  { %v45_v10 = vmul.f32 %v44_v9, %v24_v0  ;;  %v51_v12 = vstv %s82_s0  ;;  %v35_v13 = vadd.f32 %v34_v7, %v31_v4  ;;  %v48_v14 = vmul.f32 %v75_v1, %v47_v11 }
  0x19   :  { %v52_v15 = vmul.f32 %v76_v2, %v51_v12  ;;  %v55_v19 = vstv %s83_s26  ;;  %v60_v22 = vstv %s84_s27  ;;  %v63_v25 = vstv %s85_s28 }
  0x1a   :  { %v39_v17 = vadd.f32 %v38_v8, %v35_v13  ;;  %v49_v18 = vadd.f32 %v48_v14, %v45_v10  ;;  %v67_v29 = vstv %s86_s1 }
  0x1c   :  { %v42_v20 = vadd.f32 %v41_v16, %v39_v17  ;;  %v53_v21 = vadd.f32 %v52_v15, %v49_v18 }
  0x1e   :  { %v56_v23 = vadd.f32 %v55_v19, %v53_v21  ;;  %v57_v24 = vmax.f32 %v42_v20, 0.0 }
  0x20   :  { %v58_v26 = vmax.f32 %v56_v23, 0.0  ;;  %v61_v27 = vmul.f32 %v60_v22, %v57_v24 }
  0x22   :  { %v64_v28 = vmul.f32 %v63_v25, %v58_v26 }
  0x24   :  { %v65_v30 = vadd.f32 %v64_v28, %v61_v27 }
  0x26   :  { %v68_v31 = vadd.f32 %v67_v29, %v65_v30 }
  0x28   :  { %69 = vst [vmem:[%s135_s2] sm:$0xff] %v68_v31 }
  0x29   :  { %74 = vsyncpa [#allocation3], 1 }

</bundles_post_ra>
